<compile_context>
chip_gen: v6e
topology: v6e:2x2x1
jax: 0.10.0
libtpu: 0.0.40
codegen_flags: <defaults>
</compile_context>

<pallas_src>
import functools

import jax
import jax.numpy as jnp
from jax import lax
from jax.experimental import pallas as pl
from jax.experimental.pallas import tpu as pltpu
import numpy as np

_LANE = 128
_SUBLANE = 8


def _round_up(x, m):
    return (x + m - 1) // m * m


def _pad_last(x, target):
    pad = target - x.shape[-1]
    if pad == 0:
        return x
    cfg = [(0, 0)] * (x.ndim - 1) + [(0, pad)]
    return jnp.pad(x, cfg)


def _default_b_tile(B, C):
    """Batch tile: fill the MXU (b_tile*C ~ 256 rows), keep >= 2 grid steps
    when the batch allows it (v7x: 2 TensorCores), keep blocks 8-aligned."""
    target = max(_SUBLANE, pl.cdiv(256, C))   # rows so b_tile*C >= ~256
    if B < 2 * _SUBLANE:                      # too small to split into aligned tiles
        return B
    cap = min(target, B // 2)                 # >= 2 grid steps for megacore sharding
    for t in range(cap, 0, -1):
        if B % t == 0 and t % _SUBLANE == 0:
            return t
    return B                                  # fallback: single full-batch tile


def _clip_vqa_kernel(C, compute_dtype, scale_ref, labels_ref, txt_ref, img_ref,
                     wt_ref, wv_ref, out_ref):
    """One grid step = one batch tile; projection weights stay VMEM-resident."""
    Bt, lanes = out_ref.shape
    eps = jnp.float32(1e-12)

    # exp(logit_scale): SMEM scalar -> tiny (1,1) vector -> EUP exp (once/step).
    scale = jnp.exp(jnp.full((1, 1), scale_ref[0, 0], dtype=jnp.float32))

    # --- image projection (MXU, bf16 in / f32 acc) + L2 norm, scale folded ---
    v = jnp.dot(img_ref[...].astype(compute_dtype), wv_ref[...],
                preferred_element_type=jnp.float32)                   # (Bt, Dp)
    v = v * lax.rsqrt(jnp.sum(v * v, axis=-1, keepdims=True) + eps)
    v = v * scale                                                     # fold exp(logit_scale)

    # --- batched text projection: single (Bt*C, Htp) @ (Htp, Dp) MXU pass ----
    t = jnp.dot(txt_ref[...].astype(compute_dtype), wt_ref[...],
                preferred_element_type=jnp.float32)                   # (Bt*C, Dp)
    t = t * lax.rsqrt(jnp.sum(t * t, axis=-1, keepdims=True) + eps)
    t3 = t.reshape(Bt, C, t.shape[-1])                                # (Bt, C, Dp)

    # --- per-choice similarity on VPU/XLU (no tiny MXU passes) ---------------
    # TODO(synk): a fully flat (Bt*C, Dp) multiply would need a leading-dim
    # collapse reshape / jnp.repeat of the image rows whose Mosaic shape-cast
    # support is not guaranteed; keep the known-good 3-D form (tiny stage).
    logits = jnp.sum(t3 * v[:, None, :], axis=-1)                     # (Bt, C) f32

    # --- cross-entropy pieces (per-example NLL; mean taken in wrapper) -------
    m = jnp.max(logits, axis=-1, keepdims=True)                       # (Bt, 1)
    z = logits - m
    lse = jnp.log(jnp.sum(jnp.exp(z), axis=-1, keepdims=True))        # (Bt, 1)
    col = lax.broadcasted_iota(jnp.int32, (Bt, C), 1)
    onehot = (col == labels_ref[...]).astype(jnp.float32)             # labels: (Bt, 1)
    nll = lse - jnp.sum(z * onehot, axis=-1, keepdims=True)           # (Bt, 1)

    # --- argmax over choices (first-max index, exact f32 compare) ------------
    preds = jnp.min(jnp.where(logits == m, col, C), axis=-1, keepdims=True)

    # --- pack logits | nll | preds into ONE lane-dense (Bt, 128) f32 slab ----
    # Single 128-lane output block -> one dense output DMA per grid step
    # (instead of three masked width-4/1 output stores + DMAs).
    out_ref[...] = jnp.zeros((Bt, lanes), jnp.float32)
    out_ref[:, :C] = logits
    out_ref[:, C:C + 1] = nll
    out_ref[:, C + 1:C + 2] = preds.astype(jnp.float32)


def clip_guided_vqa_forward(text_feats, image_feats, w_text_proj, w_vis_proj,
                            logit_scale, labels, qid, *,
                            b_tile=None, compute_dtype=jnp.bfloat16):
    """Mimics CLIPGuidedVQA.forward on pooled encoder features.

    text_feats : (B, C, Ht)   pooled text features per (example, choice)
    image_feats: (B, Hv)      pooled image features
    returns (loss, preds, labels, qid, logits) like the PyTorch module (+logits).
    """
    B, C, Ht = text_feats.shape
    Hv = image_feats.shape[1]
    D = w_text_proj.shape[1]
    assert w_vis_proj.shape == (Hv, D) and w_text_proj.shape == (Ht, D)

    if b_tile is None:
        b_tile = _default_b_tile(B, C)
    # TODO(synk): ragged batches (B % b_tile != 0) would need padding/masking.
    assert B % b_tile == 0, "batch must be divisible by the batch tile"
    assert b_tile == B or b_tile % _SUBLANE == 0, "batch tile must be 8-aligned"
    n_tiles = B // b_tile

    # Lane-dense zero padding of the hidden / projection dims: a no-op for real
    # CLIP dims (512/768/1024); padded zeros do not change projection, norm,
    # or dot product.
    Htp, Hvp, Dp = _round_up(Ht, _LANE), _round_up(Hv, _LANE), _round_up(D, _LANE)

    # Features keep their input dtype (no extra wrapper cast pass over the
    # dominant inputs); the bf16 cast happens in-kernel after the DMA.
    txt = _pad_last(text_feats.reshape(B * C, Ht), Htp)     # reshape is view-only
    img = _pad_last(image_feats, Hvp)
    # Projection weights are tiny & grid-invariant: pad + cast once here.
    wt = _pad_last(jnp.pad(w_text_proj, ((0, Htp - Ht), (0, 0))), Dp).astype(compute_dtype)
    wv = _pad_last(jnp.pad(w_vis_proj, ((0, Hvp - Hv), (0, 0))), Dp).astype(compute_dtype)

    scale2d = jnp.asarray(logit_scale, jnp.float32).reshape(1, 1)
    labels2d = jnp.asarray(labels, jnp.int32).reshape(B, 1)

    lanes = _round_up(C + 2, _LANE)           # packed output slab width (>=128)

    # VMEM budget: double-buffered I/O tiles + resident (double-buffered)
    # weights + f32 intermediates, with 2x headroom; clamp under v7x's 64 MiB.
    in_bytes = text_feats.dtype.itemsize
    tile_bytes = (b_tile * C * Htp + b_tile * Hvp) * in_bytes \
        + b_tile * (lanes + _LANE) * 4
    w_bytes = (Htp + Hvp) * Dp * jnp.dtype(compute_dtype).itemsize
    tmp_bytes = (3 * b_tile * C * Dp + 2 * b_tile * Dp) * 4
    vmem_limit = int(min(max(2 * (2 * tile_bytes + 2 * w_bytes + tmp_bytes),
                             32 * 1024 * 1024),
                         60 * 1024 * 1024))

    kernel = functools.partial(_clip_vqa_kernel, C, compute_dtype)

    packed = pl.pallas_call(
        kernel,
        out_shape=jax.ShapeDtypeStruct((B, lanes), jnp.float32),
        grid=(n_tiles,),
        in_specs=[
            pl.BlockSpec(memory_space=pltpu.MemorySpace.SMEM),      # logit_scale (1,1)
            pl.BlockSpec((b_tile, 1), lambda i: (i, 0)),            # labels
            pl.BlockSpec((b_tile * C, Htp), lambda i: (i, 0)),      # text feats (flat)
            pl.BlockSpec((b_tile, Hvp), lambda i: (i, 0)),          # image feats
            pl.BlockSpec((Htp, Dp), lambda i: (0, 0)),              # text proj (resident)
            pl.BlockSpec((Hvp, Dp), lambda i: (0, 0)),              # visual proj (resident)
        ],
        out_specs=pl.BlockSpec((b_tile, lanes), lambda i: (i, 0)),  # packed slab
        compiler_params=pltpu.CompilerParams(
            dimension_semantics=("parallel",),
            vmem_limit_bytes=vmem_limit),
    )(scale2d, labels2d, txt, img, wt, wv)

    logits = packed[:, :C]
    nll = packed[:, C]
    preds = packed[:, C + 1].astype(jnp.int32)
    loss = jnp.mean(nll)                      # CE mean over batch (tiny XLA op)
    return loss, preds, jnp.asarray(labels, jnp.int32), qid, logits


def _reference(text_feats, image_feats, wt, wv, logit_scale, labels, compute_dtype):
    """Pure-JAX reference on the same bf16-quantized inputs (f32 math)."""
    hp = lax.Precision.HIGHEST
    f32 = jnp.float32
    tf = text_feats.astype(compute_dtype).astype(f32)
    imf = image_feats.astype(compute_dtype).astype(f32)
    wtc = wt.astype(compute_dtype).astype(f32)
    wvc = wv.astype(compute_dtype).astype(f32)
    B, C, Ht = tf.shape
    t = jnp.matmul(tf.reshape(B * C, Ht), wtc, precision=hp)
    t = t / jnp.linalg.norm(t, axis=-1, keepdims=True)
    v = jnp.matmul(imf, wvc, precision=hp)
    v = v / jnp.linalg.norm(v, axis=-1, keepdims=True)
    t = t.reshape(B, C, -1)
    sim = jnp.einsum('bij,bj->bi', t, v, precision=hp) * jnp.exp(logit_scale)
    logp = jax.nn.log_softmax(sim, axis=-1)
    loss = -jnp.mean(logp[jnp.arange(B), labels])
    preds = jnp.argmax(sim, axis=-1)
    return sim, loss, preds


if __name__ == "__main__":
    # small shapes consistent with the forward pass
    B = 2            # batch (number of images)
    C = 4            # num_choices
    Ht = 32          # pooled text feature dim
    Hv = 32          # pooled vision feature dim
    D = 32           # projection_dim

    key = jax.random.PRNGKey(0)
    k1, k2, k3, k4 = jax.random.split(key, 4)

    # synthetic pooled encoder features (stand-in for CLIP encoder outputs)
    # TODO(synk): the full CLIP vision/text transformers + tokenizer are not
    # translated; pooled features are synthesized deterministically instead.
    text_feats = jax.random.normal(k1, (B, C, Ht), jnp.float32)
    image_feats = jax.random.normal(k2, (B, Hv), jnp.float32)

    # deterministic "pretrained" parameters (projection heads + logit scale)
    w_text_proj = 0.02 * jax.random.normal(k3, (Ht, D), jnp.float32)
    w_vis_proj = 0.02 * jax.random.normal(k4, (Hv, D), jnp.float32)
    logit_scale = jnp.float32(np.log(1.0 / 0.07))   # CLIP default init

    labels = jnp.array([1, 3], dtype=jnp.int32)
    qid = ["q0", "q1"]

    loss, preds, labels_out, qid_out, logits = clip_guided_vqa_forward(
        text_feats, image_feats, w_text_proj, w_vis_proj, logit_scale, labels, qid)
    jax.block_until_ready((loss, preds, logits))

    ref_logits, ref_loss, ref_preds = _reference(
        text_feats, image_feats, w_text_proj, w_vis_proj, logit_scale, labels,
        jnp.bfloat16)

    assert np.allclose(np.asarray(logits), np.asarray(ref_logits), atol=2e-3, rtol=2e-3)
    assert np.allclose(float(loss), float(ref_loss), atol=2e-3, rtol=2e-3)
    assert np.array_equal(np.asarray(preds), np.asarray(ref_preds))

    print("KERNEL_OK")
</pallas_src>

<mosaic_0001>
module attributes {stable_mosaic.version = 11 : i64} {
  func.func @_clip_vqa_kernel(%arg0: i32, %arg1: memref<1x1xf32, #tpu.memory_space<smem>>, %arg2: memref<2x1xi32, #tpu.memory_space<vmem>>, %arg3: memref<8x128xf32, #tpu.memory_space<vmem>>, %arg4: memref<2x128xf32, #tpu.memory_space<vmem>>, %arg5: memref<128x128xbf16, #tpu.memory_space<vmem>>, %arg6: memref<128x128xbf16, #tpu.memory_space<vmem>>, %arg7: memref<2x128xf32, #tpu.memory_space<vmem>>) attributes {dimension_semantics = [#tpu.dimension_semantics<parallel>], iteration_bounds = array<i64: 1>, scalar_prefetch = 0 : i64, scratch_operands = 0 : i64, tpu.core_type = #tpu.core_type<tc>, window_params = [{transform_indices = @transform_0, window_bounds = array<i64: 1, 1>}, {transform_indices = @transform_1, window_bounds = array<i64: 2, 1>}, {transform_indices = @transform_2, window_bounds = array<i64: 8, 128>}, {transform_indices = @transform_3, window_bounds = array<i64: 2, 128>}, {pipeline_mode = #tpu.pipeline_mode<synchronous>, transform_indices = @transform_4, window_bounds = array<i64: 128, 128>}, {pipeline_mode = #tpu.pipeline_mode<synchronous>, transform_indices = @transform_5, window_bounds = array<i64: 128, 128>}, {transform_indices = @transform_6, window_bounds = array<i64: 2, 128>}]} {
    %c0 = arith.constant 0 : index
    %c0_0 = arith.constant 0 : index
    %0 = memref.load %arg1[%c0, %c0_0] : memref<1x1xf32, #tpu.memory_space<smem>>
    %1 = vector.broadcast %0 : f32 to vector<1x1xf32>
    %2 = math.exp %1 : vector<1x1xf32>
    %c0_1 = arith.constant 0 : index
    %c0_2 = arith.constant 0 : index
    %3 = vector.load %arg4[%c0_1, %c0_2] : memref<2x128xf32, #tpu.memory_space<vmem>>, vector<2x128xf32>
    %4 = arith.truncf %3 : vector<2x128xf32> to vector<2x128xbf16>
    %c0_3 = arith.constant 0 : index
    %c0_4 = arith.constant 0 : index
    %5 = vector.load %arg6[%c0_3, %c0_4] : memref<128x128xbf16, #tpu.memory_space<vmem>>, vector<128x128xbf16>
    %cst = arith.constant dense<0.000000e+00> : vector<2x128xf32>
    %6 = tpu.matmul %4, %5, %cst {dimension_numbers = #tpu.dot_dimension_numbers<[1], [0], [0], [1], [0, 0, 1, 1], [], []>} : vector<2x128xbf16>, vector<128x128xbf16>, vector<2x128xf32> -> vector<2x128xf32>
    %7 = arith.mulf %6, %6 : vector<2x128xf32>
    %cst_5 = arith.constant dense<0.000000e+00> : vector<2xf32>
    %8 = vector.multi_reduction <add>, %7, %cst_5 [1] : vector<2x128xf32> to vector<2xf32>
    %9 = vector.shape_cast %8 : vector<2xf32> to vector<2x1xf32>
    %cst_6 = arith.constant 9.99999996E-13 : f32
    %10 = vector.broadcast %cst_6 : f32 to vector<2x1xf32>
    %11 = arith.addf %9, %10 : vector<2x1xf32>
    %12 = math.rsqrt %11 : vector<2x1xf32>
    %13 = vector.broadcast %12 : vector<2x1xf32> to vector<2x128xf32>
    %14 = arith.mulf %6, %13 : vector<2x128xf32>
    %15 = vector.broadcast %2 : vector<1x1xf32> to vector<2x128xf32>
    %16 = arith.mulf %14, %15 : vector<2x128xf32>
    %c0_7 = arith.constant 0 : index
    %c0_8 = arith.constant 0 : index
    %17 = vector.load %arg3[%c0_7, %c0_8] : memref<8x128xf32, #tpu.memory_space<vmem>>, vector<8x128xf32>
    %18 = arith.truncf %17 : vector<8x128xf32> to vector<8x128xbf16>
    %c0_9 = arith.constant 0 : index
    %c0_10 = arith.constant 0 : index
    %19 = vector.load %arg5[%c0_9, %c0_10] : memref<128x128xbf16, #tpu.memory_space<vmem>>, vector<128x128xbf16>
    %cst_11 = arith.constant dense<0.000000e+00> : vector<8x128xf32>
    %20 = tpu.matmul %18, %19, %cst_11 {dimension_numbers = #tpu.dot_dimension_numbers<[1], [0], [0], [1], [0, 0, 1, 1], [], []>} : vector<8x128xbf16>, vector<128x128xbf16>, vector<8x128xf32> -> vector<8x128xf32>
    %21 = arith.mulf %20, %20 : vector<8x128xf32>
    %cst_12 = arith.constant dense<0.000000e+00> : vector<8xf32>
    %22 = vector.multi_reduction <add>, %21, %cst_12 [1] : vector<8x128xf32> to vector<8xf32>
    %23 = vector.shape_cast %22 : vector<8xf32> to vector<8x1xf32>
    %cst_13 = arith.constant 9.99999996E-13 : f32
    %24 = vector.broadcast %cst_13 : f32 to vector<8x1xf32>
    %25 = arith.addf %23, %24 : vector<8x1xf32>
    %26 = math.rsqrt %25 : vector<8x1xf32>
    %27 = vector.broadcast %26 : vector<8x1xf32> to vector<8x128xf32>
    %28 = arith.mulf %20, %27 : vector<8x128xf32>
    %29 = vector.shape_cast %28 : vector<8x128xf32> to vector<2x4x128xf32>
    %30 = vector.shape_cast %16 : vector<2x128xf32> to vector<2x1x128xf32>
    %31 = vector.broadcast %30 : vector<2x1x128xf32> to vector<2x4x128xf32>
    %32 = arith.mulf %29, %31 : vector<2x4x128xf32>
    %cst_14 = arith.constant dense<0.000000e+00> : vector<2x4xf32>
    %33 = vector.multi_reduction <add>, %32, %cst_14 [2] : vector<2x4x128xf32> to vector<2x4xf32>
    %cst_15 = arith.constant dense<0xFF800000> : vector<2xf32>
    %34 = vector.multi_reduction <maximumf>, %33, %cst_15 [1] : vector<2x4xf32> to vector<2xf32>
    %35 = vector.shape_cast %34 : vector<2xf32> to vector<2x1xf32>
    %36 = vector.broadcast %35 : vector<2x1xf32> to vector<2x4xf32>
    %37 = arith.subf %33, %36 : vector<2x4xf32>
    %38 = math.exp %37 : vector<2x4xf32>
    %cst_16 = arith.constant dense<0.000000e+00> : vector<2xf32>
    %39 = vector.multi_reduction <add>, %38, %cst_16 [1] : vector<2x4xf32> to vector<2xf32>
    %40 = vector.shape_cast %39 : vector<2xf32> to vector<2x1xf32>
    %41 = math.log %40 : vector<2x1xf32>
    %42 = tpu.iota {dimensions = array<i32: 1>} : vector<2x4xi32>
    %c0_17 = arith.constant 0 : index
    %c0_18 = arith.constant 0 : index
    %43 = vector.load %arg2[%c0_17, %c0_18] : memref<2x1xi32, #tpu.memory_space<vmem>>, vector<2x1xi32>
    %44 = vector.broadcast %43 : vector<2x1xi32> to vector<2x4xi32>
    %45 = arith.cmpi eq, %42, %44 : vector<2x4xi32>
    %46 = arith.extui %45 : vector<2x4xi1> to vector<2x4xi32>
    %47 = arith.sitofp %46 : vector<2x4xi32> to vector<2x4xf32>
    %48 = arith.mulf %37, %47 : vector<2x4xf32>
    %cst_19 = arith.constant dense<0.000000e+00> : vector<2xf32>
    %49 = vector.multi_reduction <add>, %48, %cst_19 [1] : vector<2x4xf32> to vector<2xf32>
    %50 = vector.shape_cast %49 : vector<2xf32> to vector<2x1xf32>
    %51 = arith.subf %41, %50 : vector<2x1xf32>
    %52 = vector.broadcast %35 : vector<2x1xf32> to vector<2x4xf32>
    %53 = arith.cmpf oeq, %33, %52 : vector<2x4xf32>
    %c4_i32 = arith.constant 4 : i32
    %54 = vector.broadcast %c4_i32 : i32 to vector<2x4xi32>
    %55 = arith.select %53, %42, %54 : vector<2x4xi1>, vector<2x4xi32>
    %cst_20 = arith.constant dense<2147483647> : vector<2xi32>
    %56 = vector.multi_reduction <minsi>, %55, %cst_20 [1] : vector<2x4xi32> to vector<2xi32>
    %57 = vector.shape_cast %56 : vector<2xi32> to vector<2x1xi32>
    %cst_21 = arith.constant 0.000000e+00 : f32
    %58 = vector.broadcast %cst_21 : f32 to vector<2x128xf32>
    %c0_22 = arith.constant 0 : index
    %c0_23 = arith.constant 0 : index
    %59 = vector.load %arg7[%c0_22, %c0_23] : memref<2x128xf32, #tpu.memory_space<vmem>>, vector<2x128xf32>
    tpu.vector_store %arg7[%c0_22, %c0_23], %58 {strides = array<i32>} : memref<2x128xf32, #tpu.memory_space<vmem>>, vector<2x128xf32>,
    %c0_24 = arith.constant 0 : index
    %c0_25 = arith.constant 0 : index
    %60 = vector.load %arg7[%c0_24, %c0_25] : memref<2x128xf32, #tpu.memory_space<vmem>>, vector<2x4xf32>
    tpu.vector_store %arg7[%c0_24, %c0_25], %33 {strides = array<i32>} : memref<2x128xf32, #tpu.memory_space<vmem>>, vector<2x4xf32>,
    %c0_26 = arith.constant 0 : index
    %c4 = arith.constant 4 : index
    %61 = vector.load %arg7[%c0_26, %c4] : memref<2x128xf32, #tpu.memory_space<vmem>>, vector<2x1xf32>
    tpu.vector_store %arg7[%c0_26, %c4], %51 {strides = array<i32>} : memref<2x128xf32, #tpu.memory_space<vmem>>, vector<2x1xf32>,
    %62 = arith.sitofp %57 : vector<2x1xi32> to vector<2x1xf32>
    %c0_27 = arith.constant 0 : index
    %c5 = arith.constant 5 : index
    %63 = vector.load %arg7[%c0_27, %c5] : memref<2x128xf32, #tpu.memory_space<vmem>>, vector<2x1xf32>
    tpu.vector_store %arg7[%c0_27, %c5], %62 {strides = array<i32>} : memref<2x128xf32, #tpu.memory_space<vmem>>, vector<2x1xf32>,
    return
  }
  func.func @transform_0(%arg0: i32) -> (i32, i32) {
    %c0_i32 = arith.constant 0 : i32
    %c0_i32_0 = arith.constant 0 : i32
    %c0_i32_1 = arith.constant 0 : i32
    return %c0_i32, %c0_i32_0 : i32, i32
  }
  func.func @transform_1(%arg0: i32) -> (i32, i32) {
    %c0_i32 = arith.constant 0 : i32
    %c0_i32_0 = arith.constant 0 : i32
    return %arg0, %c0_i32 : i32, i32
  }
  func.func @transform_2(%arg0: i32) -> (i32, i32) {
    %c0_i32 = arith.constant 0 : i32
    %c0_i32_0 = arith.constant 0 : i32
    return %arg0, %c0_i32 : i32, i32
  }
  func.func @transform_3(%arg0: i32) -> (i32, i32) {
    %c0_i32 = arith.constant 0 : i32
    %c0_i32_0 = arith.constant 0 : i32
    return %arg0, %c0_i32 : i32, i32
  }
  func.func @transform_4(%arg0: i32) -> (i32, i32) {
    %c0_i32 = arith.constant 0 : i32
    %c0_i32_0 = arith.constant 0 : i32
    %c0_i32_1 = arith.constant 0 : i32
    return %c0_i32, %c0_i32_0 : i32, i32
  }
  func.func @transform_5(%arg0: i32) -> (i32, i32) {
    %c0_i32 = arith.constant 0 : i32
    %c0_i32_0 = arith.constant 0 : i32
    %c0_i32_1 = arith.constant 0 : i32
    return %c0_i32, %c0_i32_0 : i32, i32
  }
  func.func @transform_6(%arg0: i32) -> (i32, i32) {
    %c0_i32 = arith.constant 0 : i32
    %c0_i32_0 = arith.constant 0 : i32
    return %arg0, %c0_i32 : i32, i32
  }
}

</mosaic_0001>

<bundles_post_ra>
// kernel: tpu_custom_call.1
= control target key start
LH: loop header
LB: loop body
LE: loop exit
PB: predicated region body
PF: predicated region fallthrough
CT: control target
= control target key end

     0   :  { %12 = vsyncpa [#allocation4], 0  ;;  %s820_s0 = inlined_call_operand.<no memory space> [shape: f32[1,1], index: 0, kind: input, shape index: {}]   ;;  %s821_s1 = inlined_call_operand.vmem [shape: s32[2,1], index: 1, kind: input, shape index: {}]   ;;  %s822_s2 = inlined_call_operand.hbm [shape: f32[8,128], index: 2, kind: input, shape index: {}]   ;;  %s823_s3 = inlined_call_operand.vmem [shape: f32[2,128], index: 3, kind: input, shape index: {}]   ;;  %s824_s4 = inlined_call_operand.hbm [shape: bf16[128,128], index: 4, kind: input, shape index: {}]   ;;  %s825_s5 = inlined_call_operand.hbm [shape: bf16[128,128], index: 5, kind: input, shape index: {}]   ;;  %s826_s6 = inlined_call_operand.hbm [shape: f32[2,128], index: 6, kind: output, shape index: {}]  }
   0x1   :  { %13 = vsyncpa [#allocation7], 0 }
   0x2   :  { %14 = vsyncpa [#allocation5], 0  ;;  %s709_s21 = smov [#allocation6]  }
   0x3   :  { %s36_s22 = sshll.u32 %s709_s21, 4  ;;  %s37_s22 = int_to_ptr.vmem [resolvable:$true] %s36_s22 }
   0x4   :  { %s631_s23 = scalar_lea.vmem %s37_s22, 1024  ;;  %p636_p1 = scmp.lt.s32.totalorder %s37_s22, %s37_s22 }
   0x5   :  { %p632_p0 = scmp.ne.s32.totalorder %s37_s22, %s631_s23  ;;  %p637_p2 = scmp.lt.s32.totalorder %s631_s23, %s631_s23 }
   0x7   :  { %p638_p3 = por %p637_p2, %p636_p1 }
   0x9   :  { %p639_p4 = pnand %p638_p3, %p632_p0 }
   0xb   :  { %642 = shalt.err (!%p639_p4)
}
   0xc   :  { %s710_s24 = smov 64   ;;  %s711_s25 = smov 4  }
   0xd   :  { %42 = dma.hbm_to_vmem [thread:$0]  %s824_s4, 1024, %s37_s22, [#allocation7], %s710_s24, %s710_s24, %s711_s25  }
   0xe   :  { %s712_s28 = smov [#allocation3]   ;;  %s713_s30 = smov [#allocation8]  }
   0xf   :  { %s25_s29 = sshll.u32 %s712_s28, 4  ;;  %s48_s7 = sshll.u32 %s713_s30, 4  ;;  %s26_s29 = int_to_ptr.vmem [resolvable:$true] %s25_s29  ;;  %s49_s7 = int_to_ptr.vmem [resolvable:$true] %s48_s7 }
  0x10   :  { %s651_s8 = scalar_lea.vmem %s26_s29, 128  ;;  %p656_p6 = scmp.lt.s32.totalorder %s26_s29, %s26_s29 }
  0x11   :  { %p652_p5 = scmp.ne.s32.totalorder %s26_s29, %s651_s8  ;;  %p657_p7 = scmp.lt.s32.totalorder %s651_s8, %s651_s8 }
  0x13   :  { %p658_p8 = por %p657_p7, %p656_p6 }
  0x15   :  { %p659_p9 = pnand %p658_p8, %p652_p5 }
  0x17   :  { %662 = shalt.err (!%p659_p9)
}
  0x18   :  { %28 = dma.hbm_to_vmem [thread:$0]  %s822_s2, 128, %s26_s29, [#allocation4]  }
  0x19   :  { %s671_s11 = scalar_lea.vmem %s49_s7, 1024  ;;  %p676_p11 = scmp.lt.s32.totalorder %s49_s7, %s49_s7 }
  0x1a   :  { %p672_p10 = scmp.ne.s32.totalorder %s49_s7, %s671_s11  ;;  %p677_p12 = scmp.lt.s32.totalorder %s671_s11, %s671_s11 }
  0x1c   :  { %p678_p13 = por %p677_p12, %p676_p11 }
  0x1e   :  { %p679_p0 = pnand %p678_p13, %p672_p10 }
  0x20   :  { %682 = shalt.err (!%p679_p0)
}
  0x21   :  { %54 = dma.hbm_to_vmem [thread:$0]  %s825_s5, 1024, %s49_s7, [#allocation7], %s710_s24, %s710_s24, %s711_s25  }
  0x22   :  { %703 = dma.done.wait [#allocation4], 128  }
  0x23   :  { %704 = vsyncadd [#allocation4], 4294967168 }
  0x24   :  { %705 = dma.done.wait [#allocation7], 2048  }
  0x25   :  { %706 = vsyncadd [#allocation7], 4294965248  ;;  %v714_v0 = vmov 0.0   ;;  %vm715_vm0 = vmmov 0   ;;  %v595_v1 = vld [vmem:[#allocation8 + $0x38] sm:$0xff]   ;;  %v597_v3 = vld [vmem:[#allocation8 + $0x30] sm:$0xff]   ;;  %v66_v32 = vstv %s820_s0  ;;  %v303_v40 = vlaneseq }
  0x26   :  { %543 = vmatprep.subr.bf16.mxu0 %v714_v0  ;;  %485 = vst [vmem:[#allocation9] sm:$0x3] %v714_v0  ;;  %563 = vmatprep.subr.bf16.mxu1 %v714_v0  ;;  %v596_v2 = vld [vmem:[#allocation6 + $0x38] sm:$0xff]   ;;  %v598_v4 = vld [vmem:[#allocation6 + $0x30] sm:$0xff]   ;;  %v599_v5 = vld [vmem:[#allocation8 + $0x28] sm:$0xff]   ;;  %vm176_vm1 = vcmask 1041408  }
  0x27   :  { %559 = vmatprep.mubr.msk.bf16.mxu0 %vm715_vm0, %v714_v0  ;;  %579 = vmatprep.mubr.msk.bf16.mxu1 %vm715_vm0, %v714_v0  ;;  %v600_v6 = vld [vmem:[#allocation6 + $0x28] sm:$0xff]   ;;  %v601_v7 = vld [vmem:[#allocation8 + $0x20] sm:$0xff]   ;;  %v603_v9 = vld [vmem:[#allocation8 + $0x18] sm:$0xff]   ;;  %v67_v33 = vmul.f32 1.442695, %v66_v32  ;;  %v788_v42 = vshrl.u32 %v303_v40, 7 }
  0x28   :  { %544 = vmatpush3.bf16.msra.mxu0 %v595_v1  ;;  %564 = vmatpush3.bf16.msra.mxu1 %v596_v2  ;;  %v602_v8 = vld [vmem:[#allocation6 + $0x20] sm:$0xff]   ;;  %v604_v10 = vld [vmem:[#allocation6 + $0x18] sm:$0xff]   ;;  %v605_v11 = vld [vmem:[#allocation8 + $0x10] sm:$0xff]   ;;  %v716_v38 = vmov 1966171168   ;;  %vm334_vm2 = vcmask 1043456  }
  0x29   :  { %545 = vmatprep.subr.bf16.mxu0 %v714_v0  ;;  %565 = vmatprep.subr.bf16.mxu1 %v714_v0  ;;  %v606_v12 = vld [vmem:[#allocation6 + $0x10] sm:$0xff]   ;;  %v607_v13 = vld [vmem:[#allocation8 + $0x8] sm:$0xff]   ;;  %v609_v15 = vld [vmem:[#allocation8] sm:$0xff]   ;;  %611 = vpow2.f32 %v67_v33  ;;  %v301_v39 = vunpack.c.l.s4 %v716_v38  ;;  %v324_v50 = vsub.s32 0, %v788_v42  ;;  %v344_v62 = vand.u32 127, %v303_v40 }
  0x2a   :  { %v608_v14 = vld [vmem:[#allocation6 + $0x8] sm:$0xff]   ;;  %v69_v16 = vld [vmem:[%s823_s3] sm:$0x3]  ;;  %v610_v17 = vld [vmem:[#allocation6] sm:$0xff]   ;;  %v717_v63 = vmov 0   ;;  %vm353_vm3 = vcmask 1041409  }
  0x2b   :  { %v184_v18 = vld [vmem:[#allocation3] sm:$0xff]  ;;  %v70_v19 = vpack.c.bf16 %v69_v16, %v69_v16  ;;  %v302_v41 = vunpack.c.0.s8 %v301_v39  ;;  %593 = vset.pattern.permute.xlu0 %v717_v63  ;;  %594 = vset.pattern.permute.xlu1 %v717_v63  ;;  %v793_v2 = vsub.s32 %v344_v62, %v788_v42  ;;  %vm356_vm4 = vcmask 25600  }
  0x2c   :  { %546 = vmatpush3.bf16.msra.mxu0 %v597_v3  ;;  %566 = vmatpush3.bf16.msra.mxu1 %v598_v4  ;;  %v185_v20 = vpack.c.bf16 %v184_v18, %v184_v18  ;;  %vm487_vm9 = vcmask 33824   ;;  %vm490_vm10 = vcmask 42024  }
  0x2d   :  { %547 = vmatprep.subr.bf16.mxu0 %v714_v0  ;;  %567 = vmatprep.subr.bf16.mxu1 %v714_v0  ;;  %v305_v46 = vsub.s32 %v302_v41, %v788_v42 }
  0x30   :  { %548 = vmatpush3.bf16.msra.mxu0 %v599_v5  ;;  %568 = vmatpush3.bf16.msra.mxu1 %v600_v6 }
  0x31   :  { %549 = vmatprep.subr.bf16.mxu0 %v714_v0  ;;  %569 = vmatprep.subr.bf16.mxu1 %v714_v0 }
  0x34   :  { %550 = vmatpush3.bf16.msra.mxu0 %v601_v7  ;;  %570 = vmatpush3.bf16.msra.mxu1 %v602_v8  ;;  %v400_v8 = vld [vmem:[%s821_s1] sm:$0x3]  ;;  %s718_s1 = smov [#allocation9]  }
  0x35   :  { %551 = vmatprep.subr.bf16.mxu0 %v714_v0  ;;  %571 = vmatprep.subr.bf16.mxu1 %v714_v0  ;;  %s498_s15 = sshll.u32 %s718_s1, 4  ;;  %s499_s15 = int_to_ptr.vmem [resolvable:$true] %s498_s15 }
  0x36   :  { %v612_v43 = vpop.eup %611  ;;  %s683_s16 = scalar_lea.vmem %s499_s15, 32  ;;  %p688_p2 = scmp.lt.s32.totalorder %s499_s15, %s499_s15 }
  0x37   :  { %p684_p1 = scmp.ne.s32.totalorder %s499_s15, %s683_s16  ;;  %p689_p3 = scmp.lt.s32.totalorder %s683_s16, %s683_s16 }
  0x38   :  { %552 = vmatpush3.bf16.msra.mxu0 %v603_v9  ;;  %572 = vmatpush3.bf16.msra.mxu1 %v604_v10  ;;  %v367_v9 = vsub.s32 1, %v788_v42 }
  0x39   :  { %553 = vmatprep.subr.bf16.mxu0 %v714_v0  ;;  %573 = vmatprep.subr.bf16.mxu1 %v714_v0  ;;  %p690_p4 = por %p689_p3, %p688_p2 }
  0x3b   :  { %p691_p5 = pnand %p690_p4, %p684_p1 }
  0x3c   :  { %554 = vmatpush3.bf16.msra.mxu0 %v605_v11  ;;  %574 = vmatpush3.bf16.msra.mxu1 %v606_v12 }
  0x3d   :  { %555 = vmatprep.subr.bf16.mxu0 %v714_v0  ;;  %575 = vmatprep.subr.bf16.mxu1 %v714_v0 }
  0x40   :  { %556 = vmatpush3.bf16.msra.mxu0 %v607_v13  ;;  %576 = vmatpush3.bf16.msra.mxu1 %v608_v14 }
  0x41   :  { %557 = vmatprep.subr.bf16.mxu0 %v714_v0  ;;  %577 = vmatprep.subr.bf16.mxu1 %v714_v0 }
  0x44   :  { %558 = vmatpush3.bf16.msra.mxu0 %v609_v15  ;;  %578 = vmatpush3.bf16.msra.mxu1 %v610_v17 }
  0x47   :  { %560 = vmatmul.mubr.bf16.vlgmr.msra.gmra.mxu0 %v70_v19  ;;  %580 = vmatmul.mubr.bf16.vlgmr.msra.gmra.mxu1 %v185_v20 }
 0x107   :  { %v169_v21 = vpop.f32.mrf.mxu0  ;;  %v284_v22 = vpop.f32.mrf.mxu1 }
 0x108   :  { %v175_v23 = vmul.f32 %v169_v21, %v169_v21  ;;  %v290_v28 = vmul.f32 %v284_v22, %v284_v22 }
 0x109   :  { %v561_v24 = vpop.f32.mrf.mxu0  ;;  %v581_v26 = vpop.f32.mrf.mxu1 }
 0x10a   :  { %v177_v25 = vsel %vm176_vm1, %v175_v23, 0.0 }
 0x10b   :  { %178 = vadd.xlane.f32.xlu0 %v177_v25  ;;  %v172_v27 = vpop.f32.mrf.mxu0  ;;  %v287_v29 = vpop.f32.mrf.mxu1 }
 0x10d   :  { %v562_v30 = vpop.f32.mrf.mxu0  ;;  %v582_v31 = vpop.f32.mrf.mxu1 }
 0x10f   :  { %291 = vadd.xlane.f32.xlu0 %v290_v28 }
 0x194   :  { %v179_v34 = vpop.xlane.xlu0 %178 }
 0x195   :  { %v180_v35 = vadd.f32 1e-12, %v179_v34 }
 0x197   :  { %613 = vrsqrt.f32 %v180_v35 }
 0x198   :  { %v292_v36 = vpop.xlane.xlu0 %291 }
 0x199   :  { %v293_v37 = vadd.f32 1e-12, %v292_v36 }
 0x19b   :  { %615 = vrsqrt.f32 %v293_v37 }
 0x1a4   :  { %v614_v44 = vpop.eup %613 }
 0x1a5   :  { %v182_v45 = vmul.f32 %v614_v44, %v169_v21 }
 0x1a7   :  { %v183_v47 = vmul.f32 %v612_v43, %v182_v45 }
 0x1a8   :  { %v616_v48 = vpop.eup %615 }
 0x1a9   :  { %v306_v49 = vrot.slane %v183_v47, %v305_v46  ;;  %v295_v51 = vmul.f32 %v616_v48, %v284_v22 }
 0x1ab   :  { %v314_v52 = vrot.slane %v306_v49, %v305_v46  ;;  %v307_v53 = vcombine.high %v306_v49, %v306_v49  ;;  %v297_v57 = vcombine.high %v295_v51, %v295_v51 }
 0x1ad   :  { %v325_v54 = vrot.slane %v314_v52, %v324_v50  ;;  %v321_v55 = vrot.slane %v307_v53, %v305_v46 }
 0x1af   :  { %v332_v56 = vmul.f32 %v325_v54, %v295_v51  ;;  %v329_v58 = vrot.slane %v321_v55, %v324_v50 }
 0x1b1   :  { %v335_v59 = vsel %vm334_vm2, %v332_v56, 0.0  ;;  %v333_v60 = vmul.f32 %v329_v58, %v297_v57 }
 0x1b2   :  { %336 = vadd.xlane.f32.xlu1 %v335_v59 }
 0x1b3   :  { %v338_v61 = vsel %vm334_vm2, %v333_v60, 0.0 }
 0x1b6   :  { %339 = vadd.xlane.f32.xlu1 %v338_v61 }
 0x1c7   :  { %451 = vbcast.lane.b32.xlu1 %v344_v62, 256 }
 0x23b   :  { %v337_v1 = vpop.xlane.xlu1 %336 }
 0x23c   :  { %v348_v4 = vrot.slane %v337_v1, %v793_v2 }
 0x23f   :  { %v340_v3 = vpop.xlane.xlu1 %339 }
 0x240   :  { %v352_v5 = vrot.slane %v340_v3, %v793_v2 }
 0x242   :  { %v354_v6 = vsel %vm353_vm3, %v352_v5, %v348_v4 }
 0x243   :  { %v357_v7 = vsel %vm356_vm4, %v354_v6, -inf  ;;  %486 = vst.msk [vmem:[#allocation9] sm:$0x3] %vm356_vm4, %v354_v6  ;;  %v452_v13 = vpop.permute.xlu1 %451 }
 0x244   :  { %358 = vmax.xlane.f32.xlu0 %v357_v7 }
 0x25a   :  { %402 = vperm.xlu0 %593, %v400_v8  }
 0x2cd   :  { %v359_v10 = vpop.xlane.xlu0 %358 }
 0x2ce   :  { %v364_v11 = vrot.slane %v359_v10, %v324_v50  ;;  %v368_v12 = vrot.slane %v359_v10, %v367_v9 }
 0x2d0   :  { %v371_v14 = vsub.f32 %v337_v1, %v364_v11  ;;  %v372_v15 = vsub.f32 %v340_v3, %v368_v12  ;;  %vm448_vm5 = vcmp.eq.f32.partialorder %v337_v1, %v364_v11  ;;  %vm449_vm6 = vcmp.eq.f32.partialorder %v340_v3, %v368_v12 }
 0x2d1   :  { %v453_v16 = vsel %vm448_vm5, %v452_v13, 4  ;;  %v454_v20 = vsel %vm449_vm6, %v452_v13, 4 }
 0x2d2   :  { %v373_v17 = vmul.f32 1.442695, %v371_v14  ;;  %456 = vperm.xlu1 %594, %v453_v16   ;;  %v375_v18 = vmul.f32 1.442695, %v372_v15 }
 0x2d4   :  { %617 = vpow2.f32 %v373_v17 }
 0x2d5   :  { %v403_v19 = vpop.permute.xlu0 %402  ;;  %619 = vpow2.f32 %v375_v18 }
 0x2d6   :  { %vm404_vm7 = vcmp.eq.s32.totalorder %v344_v62, %v403_v19  ;;  %459 = vperm.xlu1 %594, %v454_v20  }
 0x2d7   :  { %v524_v21 = vsel %vm404_vm7, 1.0, %v714_v0 }
 0x2d8   :  { %v411_v22 = vrot.slane %v524_v21, %v324_v50  ;;  %v418_v23 = vrot.slane %v524_v21, %v367_v9 }
 0x2da   :  { %413 = vbcast.lane.b32.xlu1 %v411_v22, 256 }
 0x2de   :  { %420 = vbcast.lane.b32.xlu1 %v418_v23, 256 }
 0x2e1   :  { %v618_v24 = vpop.eup %617 }
 0x2e2   :  { %380 = vperm.xlu1 %594, %v618_v24   ;;  %v620_v25 = vpop.eup %619 }
 0x2e6   :  { %383 = vperm.xlu1 %594, %v620_v25  }
 0x34d   :  { %v457_v26 = vpop.permute.xlu1 %456 }
 0x34e   :  { %v464_v28 = vrot.slane %v457_v26, %v793_v2 }
 0x351   :  { %v460_v27 = vpop.permute.xlu1 %459 }
 0x352   :  { %v468_v29 = vrot.slane %v460_v27, %v793_v2 }
 0x354   :  { %v469_v30 = vsel %vm353_vm3, %v468_v29, %v464_v28 }
 0x355   :  { %v414_v31 = vpop.permute.xlu1 %413  ;;  %v470_v0 = vsel %vm356_vm4, %v469_v30, 2147483647 }
 0x356   :  { %v424_v32 = vmul.f32 %v414_v31, %v371_v14  ;;  %v472_v33 = vshra.s32 %v470_v0, 16  ;;  %v471_v45 = vand.u32 65535, %v470_v0 }
 0x358   :  { %429 = vperm.xlu0 %593, %v424_v32   ;;  %v474_v34 = vcvt.s32.f32 %v472_v33  ;;  %v473_v48 = vcvt.s32.f32 %v471_v45 }
 0x359   :  { %v421_v35 = vpop.permute.xlu1 %420 }
 0x35a   :  { %v425_v36 = vmul.f32 %v421_v35, %v372_v15  ;;  %475 = vmin.xlane.f32.xlu1 %v474_v34 }
 0x35c   :  { %432 = vperm.xlu0 %593, %v425_v36  }
 0x35d   :  { %v381_v37 = vpop.permute.xlu1 %380 }
 0x35e   :  { %v388_v40 = vrot.slane %v381_v37, %v793_v2 }
 0x361   :  { %v384_v38 = vpop.permute.xlu1 %383 }
 0x362   :  { %v392_v39 = vrot.slane %v384_v38, %v793_v2 }
 0x364   :  { %v393_v41 = vsel %vm353_vm3, %v392_v39, %v388_v40 }
 0x365   :  { %v395_v42 = vsel %vm356_vm4, %v393_v41, 0.0 }
 0x37b   :  { %396 = vadd.xlane.f32.xlu0 %v395_v42 }
 0x3d3   :  { %v430_v43 = vpop.permute.xlu0 %429 }
 0x3d4   :  { %v437_v49 = vrot.slane %v430_v43, %v793_v2 }
 0x3d7   :  { %v433_v44 = vpop.permute.xlu0 %432 }
 0x3d8   :  { %v441_v46 = vrot.slane %v433_v44, %v793_v2 }
 0x3da   :  { %v442_v51 = vsel %vm353_vm3, %v441_v46, %v437_v49 }
 0x3db   :  { %v444_v52 = vsel %vm356_vm4, %v442_v51, 0.0 }
 0x3e3   :  { %v476_v47 = vpop.xlane.xlu1 %475 }
 0x3e4   :  { %vm477_vm8 = vcmp.eq.f32.partialorder %v474_v34, %v476_v47  ;;  %v482_v54 = vcvt.f32.s32 %v476_v47 }
 0x3e5   :  { %v478_v50 = vsel %vm477_vm8, %v473_v48, inf }
 0x3e6   :  { %479 = vmin.xlane.f32.xlu1 %v478_v50  ;;  %v483_v57 = vshll.u32 %v482_v54, 16 }
 0x3ea   :  { %445 = vadd.xlane.f32.xlu1 %v444_v52 }
 0x404   :  { %v397_v53 = vpop.xlane.xlu0 %396 }
 0x405   :  { %621 = vlog2.f32 %v397_v53 }
 0x412   :  { %v622_v55 = vpop.eup %621 }
 0x413   :  { %v399_v60 = vmul.f32 0.6931472, %v622_v55 }
 0x46f   :  { %v480_v56 = vpop.xlane.xlu1 %479 }
 0x470   :  { %v481_v58 = vcvt.f32.s32 %v480_v56 }
 0x472   :  { %v484_v59 = vadd.s32 %v483_v57, %v481_v58 }
 0x473   :  { %v446_v61 = vpop.xlane.xlu1 %445 }
 0x474   :  { %v489_v62 = vcvt.s32.f32 %v484_v59  ;;  %v447_v63 = vsub.f32 %v399_v60, %v446_v61 }
 0x476   :  { %488 = vst.msk [vmem:[#allocation9] sm:$0x3] %vm487_vm9, %v447_v63 }
 0x477   :  { %491 = vst.msk [vmem:[#allocation9] sm:$0x3] %vm490_vm10, %v489_v62 }
 0x478   :  { %694 = shalt.err (!%p691_p5)
}
 0x479   :  { %501 = dma.vmem_to_hbm [thread:$0]  %s499_s15, 32, %s826_s6, [#allocation5]  }
 0x47a   :  { %707 = dma.done.wait [#allocation5], 32  }
 0x47b   :  { %708 = vsyncadd [#allocation5], 4294967264 }
 0x47c   :  { %505 = vsyncpa [#allocation4], 1 }
 0x47d   :  { %506 = vsyncpa [#allocation7], 1 }
 0x47e   :  { %507 = vsyncpa [#allocation5], 1 }

</bundles_post_ra>
